<compile_context>
chip_gen: v5e
topology: v5e:2x2
jax: 0.10.0
libtpu: 0.0.40
codegen_flags: <defaults>
</compile_context>

<pallas_src>
import functools

import jax
import jax.numpy as jnp
from jax.experimental import pallas as pl
from jax.experimental.pallas import tpu as pltpu

EPSILON = 1e-6  # matches the module-level `epsilon` used by get_eps in the repo


# ----------------------------------------------------------------------------
# Kernels
# ----------------------------------------------------------------------------
def _fused_select_kernel(eps_ref, qz_ref, x_ref, o_ref, *, temperature):
    # eps_ref: (1, M, N)   Gumbel-uniform noise for this batch element (pre-transposed)
    # qz_ref : (M, N)      learnable logits, pre-transposed (shared across batch)
    # x_ref  : (1, N, CT)  this batch element's input, flattened to a lane-dense slab
    # o_ref  : (1, M, CT)
    inv_temp = 1.0 / temperature
    eps = eps_ref[0]                                        # (M, N)
    g = -jnp.log(-jnp.log(eps))                             # Gumbel noise
    y = (qz_ref[...] + g) * inv_temp                        # (M, N)
    # torch.softmax over the N axis == softmax over the last axis in (M, N) layout.
    y = y - jnp.max(y, axis=-1, keepdims=True)
    e = jnp.exp(y)
    denom = jnp.sum(e, axis=-1, keepdims=True)              # (M, 1)
    z = e * pl.reciprocal(denom, approx=True)               # (M, N), rows sum to ~1
    # out[m, ct] = sum_n z[m, n] * x[n, ct]   -- single MXU matmul per batch element
    out = jnp.dot(z.astype(x_ref.dtype), x_ref[0],
                  preferred_element_type=jnp.float32)       # (M, CT)
    o_ref[0] = out.astype(o_ref.dtype)


def _gather_rows_kernel(ind_ref, x_ref, o_ref):
    # Eval path: pure copy of the DMA-gathered row.
    # ind_ref: (M,) int32 in SMEM (scalar prefetch) -- used only by the index_map.
    # x_ref  : (1, 1, C, T) block of x (the selected electrode row)
    # o_ref  : (1, 1, C, T)
    del ind_ref
    o_ref[...] = x_ref[...]


# ----------------------------------------------------------------------------
# Wrappers
# ----------------------------------------------------------------------------
def selection_layer_forward_train(x, qz_loga, eps, temperature=1.0):
    """Training-mode forward (Gumbel-softmax relaxed selection)."""
    B, C, N, T = x.shape
    _, M = qz_loga.shape
    CT = C * T

    # Layout plumbing in the wrapper (one pass each), so the kernel sees a clean
    # (M,N)@(N,CT) matmul with a lane-dense output slab.
    x2 = jnp.reshape(jnp.transpose(x, (0, 2, 1, 3)), (B, N, CT))   # (B, N, C*T)
    qz_t = jnp.transpose(qz_loga)                                   # (M, N)
    eps_t = jnp.transpose(eps, (0, 2, 1))                           # (B, M, N)

    kernel = functools.partial(_fused_select_kernel, temperature=float(temperature))
    out2 = pl.pallas_call(
        kernel,
        out_shape=jax.ShapeDtypeStruct((B, M, CT), x.dtype),
        grid_spec=pltpu.PrefetchScalarGridSpec(
            num_scalar_prefetch=0,
            grid=(B,),
            in_specs=[
                pl.BlockSpec((1, M, N), lambda b: (b, 0, 0)),
                pl.BlockSpec((M, N), lambda b: (0, 0)),      # constant block: no re-DMA per step
                pl.BlockSpec((1, N, CT), lambda b: (b, 0, 0)),
            ],
            out_specs=pl.BlockSpec((1, M, CT), lambda b: (b, 0, 0)),
        ),
        compiler_params=pltpu.CompilerParams(
            dimension_semantics=("parallel",),               # megacore-shard batch on v7x
            vmem_limit_bytes=32 * 1024 * 1024,
        ),
    )(eps_t, qz_t, x2)

    # (B, M, C*T) -> (B, C, M, T)
    return jnp.transpose(jnp.reshape(out2, (B, M, C, T)), (0, 2, 1, 3))


def selection_layer_forward_eval(x, qz_loga):
    """Eval-mode forward (hard argmax one-hot selection == row gather)."""
    B, C, N, T = x.shape
    _, M = qz_loga.shape

    # jnp.argmax takes the first max on ties, matching torch.argmax.
    ind = jnp.argmax(qz_loga, axis=0).astype(jnp.int32)             # (M,)

    # Put the gathered axis (N) outside the last two dims so the DMA gather only
    # reads the M selected rows.  (In a real pipeline x would already be produced
    # in this layout; the transpose here is just wrapper plumbing.)
    x_g = jnp.transpose(x, (0, 2, 1, 3))                            # (B, N, C, T)

    out_g = pl.pallas_call(
        _gather_rows_kernel,
        out_shape=jax.ShapeDtypeStruct((B, M, C, T), x.dtype),
        grid_spec=pltpu.PrefetchScalarGridSpec(
            num_scalar_prefetch=1,                                  # ind -> SMEM
            grid=(B, M),
            in_specs=[
                pl.BlockSpec((1, 1, C, T),
                             lambda b, m, ind_ref: (b, ind_ref[m], 0, 0)),
            ],
            out_specs=pl.BlockSpec((1, 1, C, T),
                                   lambda b, m, ind_ref: (b, m, 0, 0)),
        ),
        compiler_params=pltpu.CompilerParams(
            dimension_semantics=("parallel", "arbitrary"),
            vmem_limit_bytes=32 * 1024 * 1024,
        ),
    )(ind, x_g)

    return jnp.transpose(out_g, (0, 2, 1, 3))                       # (B, C, M, T)


# ----------------------------------------------------------------------------
# Pure-JAX references (for correctness checks)
# ----------------------------------------------------------------------------
def _reference_train(x, qz_loga, eps, temperature=1.0):
    g = -jnp.log(-jnp.log(eps))                             # (B, N, M)
    y = (qz_loga[None] + g) / temperature
    z = jax.nn.softmax(y, axis=1)                           # softmax over N
    z_t = jnp.swapaxes(z[:, None], 2, 3)                    # (B, 1, M, N)
    return jnp.matmul(z_t, x)                               # (B, C, M, T)


def _reference_eval(x, qz_loga):
    ind = jnp.argmax(qz_loga, axis=0)
    return x[:, :, ind, :]                                  # (B, C, M, T)


# ----------------------------------------------------------------------------
# Main
# ----------------------------------------------------------------------------
if __name__ == "__main__":
    # TSception-style shapes: x = (batch, 1 feature map, N electrodes, T samples).
    B, C, N, M, T = 2, 1, 16, 8, 256
    temperature = 1.0

    key = jax.random.PRNGKey(0)
    k_param, k_x, k_eps = jax.random.split(key, 3)

    # Deterministic parameter init: torch.randn(N, M) / 100
    qz_loga = jax.random.normal(k_param, (N, M), dtype=jnp.float32) / 100.0
    # Input x (NCHW)
    x = jax.random.normal(k_x, (B, C, N, T), dtype=jnp.float32)
    # Gumbel uniform noise in (EPSILON, 1 - EPSILON), as get_eps does
    eps = jax.random.uniform(
        k_eps, (B, N, M), dtype=jnp.float32,
        minval=EPSILON, maxval=1.0 - EPSILON)

    # --- training path ---
    out = jax.block_until_ready(
        selection_layer_forward_train(x, qz_loga, eps, temperature))
    ref = _reference_train(x, qz_loga, eps, temperature)
    assert out.shape == (B, C, M, T)
    # tolerance relaxed slightly for pl.reciprocal(approx=True) in the softmax
    assert jnp.allclose(out, ref, atol=5e-3, rtol=5e-3), "train mismatch vs reference"

    # --- eval (hard one-hot / gather) path ---
    out_eval = jax.block_until_ready(selection_layer_forward_eval(x, qz_loga))
    ref_eval = _reference_eval(x, qz_loga)
    assert out_eval.shape == (B, C, M, T)
    assert jnp.allclose(out_eval, ref_eval), "eval mismatch vs reference"

    print("KERNEL_OK")
</pallas_src>

<mosaic_0001>
module attributes {stable_mosaic.version = 11 : i64} {
  func.func @_fused_select_kernel(%arg0: i32, %arg1: memref<1x8x16xf32, #tpu.memory_space<vmem>>, %arg2: memref<8x16xf32, #tpu.memory_space<vmem>>, %arg3: memref<1x16x256xf32, #tpu.memory_space<vmem>>, %arg4: memref<1x8x256xf32, #tpu.memory_space<vmem>>) attributes {dimension_semantics = [#tpu.dimension_semantics<parallel>], iteration_bounds = array<i64: 2>, scalar_prefetch = 0 : i64, scratch_operands = 0 : i64, tpu.core_type = #tpu.core_type<tc>, window_params = [{transform_indices = @transform_0, window_bounds = array<i64: 1, 8, 16>}, {pipeline_mode = #tpu.pipeline_mode<synchronous>, transform_indices = @transform_1, window_bounds = array<i64: 8, 16>}, {transform_indices = @transform_2, window_bounds = array<i64: 1, 16, 256>}, {transform_indices = @transform_3, window_bounds = array<i64: 1, 8, 256>}]} {
    %c0 = arith.constant 0 : index
    %c0_0 = arith.constant 0 : index
    %c0_1 = arith.constant 0 : index
    %0 = vector.load %arg1[%c0, %c0_0, %c0_1] : memref<1x8x16xf32, #tpu.memory_space<vmem>>, vector<1x8x16xf32>
    %1 = vector.shape_cast %0 : vector<1x8x16xf32> to vector<8x16xf32>
    %2 = math.log %1 : vector<8x16xf32>
    %cst = arith.constant 0.000000e+00 : f32
    %3 = vector.broadcast %cst : f32 to vector<8x16xf32>
    %4 = arith.subf %3, %2 : vector<8x16xf32>
    %5 = math.log %4 : vector<8x16xf32>
    %cst_2 = arith.constant 0.000000e+00 : f32
    %6 = vector.broadcast %cst_2 : f32 to vector<8x16xf32>
    %7 = arith.subf %6, %5 : vector<8x16xf32>
    %c0_3 = arith.constant 0 : index
    %c0_4 = arith.constant 0 : index
    %8 = vector.load %arg2[%c0_3, %c0_4] : memref<8x16xf32, #tpu.memory_space<vmem>>, vector<8x16xf32>
    %9 = arith.addf %8, %7 : vector<8x16xf32>
    %cst_5 = arith.constant 1.000000e+00 : f32
    %10 = vector.broadcast %cst_5 : f32 to vector<8x16xf32>
    %11 = arith.mulf %9, %10 : vector<8x16xf32>
    %cst_6 = arith.constant dense<0xFF800000> : vector<8xf32>
    %12 = vector.multi_reduction <maximumf>, %11, %cst_6 [1] : vector<8x16xf32> to vector<8xf32>
    %13 = vector.shape_cast %12 : vector<8xf32> to vector<8x1xf32>
    %14 = vector.broadcast %13 : vector<8x1xf32> to vector<8x16xf32>
    %15 = arith.subf %11, %14 : vector<8x16xf32>
    %16 = math.exp %15 : vector<8x16xf32>
    %cst_7 = arith.constant dense<0.000000e+00> : vector<8xf32>
    %17 = vector.multi_reduction <add>, %16, %cst_7 [1] : vector<8x16xf32> to vector<8xf32>
    %18 = vector.shape_cast %17 : vector<8xf32> to vector<8x1xf32>
    %19 = tpu.reciprocal %18 {approx = true} : vector<8x1xf32> -> vector<8x1xf32>
    %20 = vector.broadcast %19 : vector<8x1xf32> to vector<8x16xf32>
    %21 = arith.mulf %16, %20 : vector<8x16xf32>
    %c0_8 = arith.constant 0 : index
    %c0_9 = arith.constant 0 : index
    %c0_10 = arith.constant 0 : index
    %22 = vector.load %arg3[%c0_8, %c0_9, %c0_10] : memref<1x16x256xf32, #tpu.memory_space<vmem>>, vector<1x16x256xf32>
    %23 = vector.shape_cast %22 : vector<1x16x256xf32> to vector<16x256xf32>
    %cst_11 = arith.constant dense<0.000000e+00> : vector<8x256xf32>
    %24 = tpu.matmul %21, %23, %cst_11 {dimension_numbers = #tpu.dot_dimension_numbers<[1], [0], [0], [1], [0, 0, 1, 1], [], []>} : vector<8x16xf32>, vector<16x256xf32>, vector<8x256xf32> -> vector<8x256xf32>
    %c0_12 = arith.constant 0 : index
    %c0_13 = arith.constant 0 : index
    %c0_14 = arith.constant 0 : index
    %25 = vector.load %arg4[%c0_12, %c0_13, %c0_14] : memref<1x8x256xf32, #tpu.memory_space<vmem>>, vector<1x8x256xf32>
    %26 = vector.shape_cast %25 : vector<1x8x256xf32> to vector<8x256xf32>
    %27 = vector.shape_cast %24 : vector<8x256xf32> to vector<1x8x256xf32>
    tpu.vector_store %arg4[%c0_12, %c0_13, %c0_14], %27 {strides = array<i32>} : memref<1x8x256xf32, #tpu.memory_space<vmem>>, vector<1x8x256xf32>,
    return
  }
  func.func @transform_0(%arg0: i32) -> (i32, i32, i32) {
    %c0_i32 = arith.constant 0 : i32
    %c0_i32_0 = arith.constant 0 : i32
    %c0_i32_1 = arith.constant 0 : i32
    return %arg0, %c0_i32, %c0_i32_0 : i32, i32, i32
  }
  func.func @transform_1(%arg0: i32) -> (i32, i32) {
    %c0_i32 = arith.constant 0 : i32
    %c0_i32_0 = arith.constant 0 : i32
    %c0_i32_1 = arith.constant 0 : i32
    return %c0_i32, %c0_i32_0 : i32, i32
  }
  func.func @transform_2(%arg0: i32) -> (i32, i32, i32) {
    %c0_i32 = arith.constant 0 : i32
    %c0_i32_0 = arith.constant 0 : i32
    %c0_i32_1 = arith.constant 0 : i32
    return %arg0, %c0_i32, %c0_i32_0 : i32, i32, i32
  }
  func.func @transform_3(%arg0: i32) -> (i32, i32, i32) {
    %c0_i32 = arith.constant 0 : i32
    %c0_i32_0 = arith.constant 0 : i32
    %c0_i32_1 = arith.constant 0 : i32
    return %arg0, %c0_i32, %c0_i32_0 : i32, i32, i32
  }
}

</mosaic_0001>

<bundles_post_ra>
// kernel: tpu_custom_call.1
= control target key start
LH: loop header
LB: loop body
LE: loop exit
PB: predicated region body
PF: predicated region fallthrough
CT: control target
= control target key end

     0   :  { %8 = vsyncpa [#allocation3], 0  ;;  %s895_s0 = inlined_call_operand.hbm [shape: f32[2,8,16], index: 0, kind: input, shape index: {}]   ;;  %s896_s1 = inlined_call_operand.hbm [shape: f32[8,16], index: 1, kind: input, shape index: {}]   ;;  %s897_s2 = inlined_call_operand.hbm [shape: f32[2,16,256], index: 2, kind: input, shape index: {}]   ;;  %s898_s3 = inlined_call_operand.hbm [shape: f32[2,8,256], index: 3, kind: output, shape index: {}]  }
   0x1   :  { %10 = vsyncpa [#allocation3 + $0x1], 0 }
   0x2   :  { %11 = vsyncpa [#allocation6], 0 }
   0x3   :  { %12 = vsyncpa [#allocation4], 0 }
   0x4   :  { %14 = vsyncpa [#allocation4 + $0x1], 0  ;;  %s713_s12 = smov 0   ;;  %s715_s13 = smov 0  }
   0x5   :  { %s717_s14 = smov 0   ;;  %s719_s15 = smov 0  }
   0x6 LB: > { %s734_s16 = sadd.s32 1, %s688_s15   ;;  %s27_s17 = sadd.s32 1, %s684_s14  ;;  %s688_s15 = sphi %s719_s15, %s911_s15   ;;  %s684_s14 = sphi %s717_s14, %s910_s14   ;;  %s680_s13 = sphi %s715_s13, %s909_s13   ;;  %s676_s12 = sphi %s713_s12, %s908_s12  }
   0x7   : > { %s24_s18 = ssub.s32 %s688_s15, %s734_s16  ;;  %p34_p0 = scmp.ne.s32.totalorder %s684_s14, %s680_s13 }
   0x8   : > { %p25_p1 = scmp.eq.s32.totalorder %s24_s18, 0  ;;  %p35_p2 = scmp.eq.s32.totalorder %s688_s15, 0 }
   0x9   : > { %p478_p4 = scmp.lt.s32.totalorder %s688_s15, 2  ;;  %s149_s20 = sand.u32 1, %s688_s15  }
   0xa   : > { %s745_s19 = scalar_select %p25_p1, %s684_s14, %s27_s17  }
   0xb   : > { %p36_p5 = por %p35_p2, %p34_p0  ;;  %s151_s21 = sand.u32 1, %s684_s14  }
   0xc   : > { %s433_s22 = sshll.u32 %s151_s21, 3  ;;  %s434_s23 = sshll.u32 %s688_s15, 3 }
   0xd   : > { %s157_s26 = scalar_lea.hbm %s895_s0, %s434_s23  ;;  %s153_s28 = scalar_lea.vmem [#allocation2], %s433_s22 }
   0xe   : > { %s159_s27 = sshll.u32 %s157_s26, 4  ;;  %s161_s29 = sshll.u32 %s153_s28, 4  ;;  %s160_s27 = int_to_ptr.hbm [resolvable:$true] %s159_s27  ;;  %s162_s29 = int_to_ptr.vmem [resolvable:$true] %s161_s29 }
   0xf   : > { %p758_p6 = pnand %p478_p4, %p36_p5  ;;  %s435_s4 = sshll.u32 %s151_s21, 5 }
  0x10   : > { %s172_s5 = scalar_lea.vmem [#allocation7], %s435_s4  ;;  %s764_s7 = scalar_lea.sflag [#allocation3], %s149_s20 }
  0x11   : > { %s762_s6 = sshll.u32 %s172_s5, 4  ;;  %s524_s8 = sshra.s32 %s160_s27, 4  ;;  %s525_s8 = int_to_ptr.hbm [resolvable:$true] %s524_s8  ;;  %s181_s6 = int_to_ptr.vmem [resolvable:$true] %s762_s6 }
  0x12   : > { %s526_s9 = scalar_lea.hbm %s525_s8, 8  ;;  %p528_p8 = pneg %p758_p6 }
  0x13   : > { %p527_p7 = scmp.ne.s32.totalorder %s525_s8, %s526_s9  ;;  %s531_s17 = scalar_lea.hbm %s895_s0, 16 }
  0x14   : > { %p532_p11 = scmp.lt.s32.totalorder %s525_s8, %s895_s0  ;;  %p533_p12 = scmp.lt.s32.totalorder %s531_s17, %s526_s9 }
  0x15   : > { %p529_p9 = pnand %p528_p8, %p527_p7 }
  0x16   : > { %p534_p13 = por %p533_p12, %p532_p11 }
  0x17   : > { %p530_p10 = pneg %p529_p9 }
  0x19   : > { %p535_p1 = pnand %p534_p13, %p530_p10 }
  0x1b   : > { %538 = shalt.err (!%p535_p1)
}
  0x1c   : > { %469 = dma.hbm_to_vmem [thread:$0]  (!%p758_p6), %s160_s27, 128, %s162_s29, %s764_s7  }
  0x1d   : > { %s782_s20 = sadd.s32 4294967295, %s688_s15   ;;  %s429_s22 = sadd.s32 4294967294, %s688_s15  }
  0x1e   : > { %p40_p2 = scmp.ne.s32.totalorder %s680_s13, %s676_s12  ;;  %p899_p4 = scmp.eq.s32.totalorder %s782_s20, 0 }
  0x1f   : > { %p111_p5 = scmp.eq.s32.totalorder %s782_s20, 1  ;;  %p117_p7 = scmp.eq.s32.totalorder %s429_s22, 1 }
  0x20   : > { %p791_p9 = por %p899_p4, %p40_p2  ;;  %p430_p10 = scmp.ge.s32.totalorder %s688_s15, 1 }
  0x21   : > { %p799_p11 = por %p111_p5, %p34_p0  ;;  %p803_p12 = por %p117_p7, %p40_p2 }
  0x22   : > { %p124_p13 = scmp.lt.s32.totalorder %s688_s15, 3  ;;  %s136_s28 = sshll.u32 %s896_s1, 4  ;;  %s137_s28 = int_to_ptr.hbm [resolvable:$true] %s136_s28 }
  0x23   : > { %s690_s4 = smov [#allocation5]   ;;  %s450_s8 = sshll.u32 %s688_s15, 5 }
  0x24   : > { %p811_p1 = pnand %p430_p10, %p124_p13  ;;  %s138_s5 = sshll.u32 %s690_s4, 4  ;;  %s139_s5 = int_to_ptr.vmem [resolvable:$true] %s138_s5 }
  0x25   : > { %s177_s11 = scalar_lea.hbm %s897_s2, %s450_s8  ;;  %s591_s27 = scalar_lea.hbm %s897_s2, 64 }
  0x26   : > { %p462_p0 = pneg %p811_p1  ;;  %s178_s17 = sshll.u32 %s177_s11, 4  ;;  %s179_s17 = int_to_ptr.hbm [resolvable:$true] %s178_s17 }
  0x27   : > { %s584_s18 = sshra.s32 %s179_s17, 4  ;;  %s585_s18 = int_to_ptr.hbm [resolvable:$true] %s584_s18 }
  0x28   : > { %p463_p2 = pnand %p462_p0, %p899_p4  ;;  %s586_s21 = scalar_lea.hbm %s585_s18, 32 }
  0x29   : > { %p587_p5 = scmp.ne.s32.totalorder %s585_s18, %s586_s21  ;;  %p592_p13 = scmp.lt.s32.totalorder %s585_s18, %s897_s2 }
  0x2a   : > { %465 = dma.hbm_to_vmem [thread:$0]  (!%p463_p2), %s137_s28, 128, %s139_s5, [#allocation6]  }
  0x2b   : > { %p589_p7 = pnand %p587_p5, %p528_p8  ;;  %p593_p0 = scmp.lt.s32.totalorder %s591_s27, %s586_s21 }
  0x2d   : > { %p590_p10 = pneg %p589_p7  ;;  %p594_p3 = por %p593_p0, %p592_p13 }
  0x2f   : > { %p595_p4 = pnand %p594_p3, %p590_p10 }
  0x31   : > { %598 = shalt.err (!%p595_p4)
}
  0x32   : > { %s691_s28 = smov 256   ;;  %s692_s5 = smov 16  }
  0x33   : > { %472 = dma.hbm_to_vmem [thread:$0]  (!%p758_p6), %s179_s17, 512, %s181_s6, %s764_s7, %s691_s28, %s691_s28, %s692_s5  }
  0x34   : > { %192 = sbr.rel (%p811_p1) target bundleno = 473 (0x1d9), region = 32  ;;  %s194_s8 = sand.u32 (!%p811_p1), 1, %s782_s20  }
  0x35   : > { %s841_s10 = sand.u32 (!%p811_p1), 1, %s680_s13   ;;  %s195_s18 = scalar_lea.sflag (!%p811_p1), [#allocation3], %s194_s8 }
  0x36   : > { %s439_s11 = sshll.u32 (!%p811_p1), %s841_s10, 3 }
  0x37   : > { %s198_s21 = scalar_lea.vmem (!%p811_p1), [#allocation2], %s439_s11 }
  0x39   : > { %659 = dma.done.wait (%p791_p9), %s195_s18, 128  }
  0x3a   : > { %661 = vsyncadd (%p791_p9), %s195_s18, 4294967168  ;;  %p905_p3 = scmp.eq.s32.totalorder %s782_s20, 0 }
  0x3c   : > { %663 = dma.done.wait (%p905_p3), [#allocation6], 128   ;;  %p906_p6 = pmov %p905_p3 }
  0x3d   : > { %s441_s30 = sshll.u32 %s841_s10, 5 }
  0x3e   : > { %665 = vsyncadd (%p906_p6), [#allocation6], 4294967168  ;;  %s213_s6 = scalar_lea.vmem [#allocation7], %s441_s30 }
  0x3f   : > { %667 = dma.done.wait (%p791_p9), %s195_s18, 512  }
  0x40   : > { %669 = vsyncadd (%p791_p9), %s195_s18, 4294966784  ;;  %v242_v0 = vld [vmem:[%s198_s21] sm:$0xff]  ;;  %v249_v6 = vld [vmem:[#allocation5] sm:$0xff]  ;;  %vm251_vm0 = vcmask 130048   ;;  %s442_s7 = sshll.u32 %s841_s10, 4  ;;  %s451_s23 = sshll.u32 %s782_s20, 4 }
  0x41   : > { %516 = vlog2.f32 %v242_v0  ;;  %v265_v15 = vld [vmem:[%s213_s6 + $0x10] sm:$0xff]  ;;  %v266_v16 = vld [vmem:[%s213_s6 + $0x18] sm:$0xff]  ;;  %v263_v17 = vld [vmem:[%s213_s6] sm:$0xff]  ;;  %s324_s22 = scalar_lea.hbm %s898_s3, %s451_s23  ;;  %s241_s26 = scalar_lea.vmem [#allocation8], %s442_s7 }
  0x42   : > { %284 = vmatpush.msra.mxu0 %v265_v15  ;;  %304 = vmatpush.msra.mxu1 %v266_v16  ;;  %v264_v18 = vld [vmem:[%s213_s6 + $0x8] sm:$0xff]  ;;  %s326_s27 = sshll.u32 %s241_s26, 4  ;;  %s328_s4 = sshll.u32 %s324_s22, 4  ;;  %s327_s27 = int_to_ptr.vmem [resolvable:$true] %s326_s27  ;;  %s329_s4 = int_to_ptr.hbm [resolvable:$true] %s328_s4 }
  0x43   : > { %s313_s9 = scalar_lea.sflag [#allocation4], %s841_s10  ;;  %s628_s28 = sshra.s32 %s329_s4, 4  ;;  %s629_s28 = int_to_ptr.hbm [resolvable:$true] %s628_s28 }
  0x44   : > { %285 = vmatpush.msra.mxu0 %v263_v17  ;;  %305 = vmatpush.msra.mxu1 %v264_v18  ;;  %s630_s5 = scalar_lea.hbm %s629_s28, 16  ;;  %s634_s11 = scalar_lea.hbm %s898_s3, 32 }
  0x45   : > { %p631_p8 = scmp.ne.s32.totalorder %s629_s28, %s630_s5  ;;  %p635_p1 = scmp.lt.s32.totalorder %s629_s28, %s898_s3 }
  0x46   : > { %p636_p2 = scmp.lt.s32.totalorder %s634_s11, %s630_s5 }
  0x47   : > { %v517_v1 = vpop.eup %516  ;;  %p632_p4 = pnand %p631_p8, %p799_p11 }
  0x48   : > { %v244_v2 = vmul.f32 0.6931472, %v517_v1  ;;  %p637_p5 = por %p636_p2, %p635_p1 }
  0x49   : > { %p633_p9 = pneg %p632_p4 }
  0x4a   : > { %v245_v3 = vsub.f32 0.0, %v244_v2 }
  0x4b   : > { %p638_p7 = pnand %p637_p5, %p633_p9 }
  0x4c   : > { %518 = vlog2.f32 %v245_v3 }
  0x52   : > { %v519_v4 = vpop.eup %518 }
  0x53   : > { %v247_v5 = vmul.f32 0.6931472, %v519_v4 }
  0x55   : > { %v248_v7 = vsub.f32 0.0, %v247_v5 }
  0x57   : > { %v250_v8 = vadd.f32 %v249_v6, %v248_v7 }
  0x59   : > { %v252_v9 = vsel %vm251_vm0, %v250_v8, -inf }
  0x5a   : > { %253 = vmax.xlane.f32.xlu0 %v252_v9 }
  0xcd   : > { %v254_v10 = vpop.xlane.xlu0 %253 }
  0xce   : > { %v255_v11 = vsub.f32 %v250_v8, %v254_v10 }
  0xd0   : > { %v256_v12 = vmul.f32 1.442695, %v255_v11 }
  0xd2   : > { %520 = vpow2.f32 %v256_v12 }
  0xd8   : > { %v521_v13 = vpop.eup %520 }
  0xd9   : > { %v258_v14 = vsel %vm251_vm0, %v521_v13, 0.0 }
  0xda   : > { %259 = vadd.xlane.f32.xlu0 %v258_v14 }
 0x14d   : > { %v260_v19 = vpop.xlane.xlu0 %259 }
 0x14e   : > { %522 = vrcp.f32 %v260_v19 }
 0x154   : > { %v523_v20 = vpop.eup %522 }
 0x155   : > { %v262_v21 = vmul.f32 %v523_v20, %v521_v13 }
 0x157   : > { %443 = vmatmul.msk.f32.vlgmr.msra.gmra.mxu0 %vm251_vm0, %v262_v21  ;;  %444 = vmatmul.msk.f32.vlgmr.msra.gmra.mxu1 %vm251_vm0, %v262_v21 }
 0x1d4   : > { %v287_v22 = vpop.f32.mrf.mxu0  ;;  %v307_v23 = vpop.f32.mrf.mxu1 }
 0x1d5   : > { %310 = vst [vmem:[%s241_s26] sm:$0xff] %v287_v22 }
 0x1d6   : > { %311 = vst [vmem:[%s241_s26 + $0x8] sm:$0xff] %v307_v23 }
 0x1d7   : > { %641 = shalt.err (!%p638_p7)
}
 0x1d8   : > { %460 = dma.vmem_to_hbm [thread:$0]  (%p799_p11), %s327_s27, 256, %s329_s4, %s313_s9  }
 0x1d9 PF: > { %s340_s10 = sand.u32 1, %s676_s12   ;;  %p907_p10 = scmp.ge.s32.totalorder %s688_s15, 2 }
 0x1da   : > { %s341_s30 = scalar_lea.sflag [#allocation4], %s340_s10 }
 0x1db   : > { %p474_p13 = pnand %p907_p10, %p803_p12 }
 0x1dd   : > { %p475_p0 = pneg %p474_p13 }
 0x1df   : > { %671 = dma.done.wait (%p475_p0), %s341_s30, 256  }
 0x1e0   : > { %673 = vsyncadd (%p475_p0), %s341_s30, 4294967040  ;;  %p17_p3 = scmp.ge.s32.totalorder %s734_s16, 4   ;;  %s908_s12 = smov %s680_s13 }
 0x1e1   : > { %s909_s13 = smov %s684_s14  ;;  %s910_s14 = smov %s745_s19 }
 0x1e2   : > { %s911_s15 = smov %s734_s16  ;;  %19 = sbr.rel (!%p17_p3) target bundleno = 6 (0x6), region = 92 }
 0x1e7   :  { %347 = vsyncpa [#allocation3], 1 }
 0x1e8   :  { %349 = vsyncpa [#allocation3 + $0x1], 1 }
 0x1e9   :  { %350 = vsyncpa [#allocation6], 1 }
 0x1ea   :  { %351 = vsyncpa [#allocation4], 1 }
 0x1eb   :  { %353 = vsyncpa [#allocation4 + $0x1], 1 }

</bundles_post_ra>
